<compile_context>
chip_gen: v6e
topology: v6e:2x2x1
jax: 0.10.0
libtpu: 0.0.40
codegen_flags: <defaults>
</compile_context>

<pallas_src>
from functools import partial

import jax
import jax.numpy as jnp
from jax.experimental import pallas as pl
from jax.experimental.pallas import tpu as pltpu

ALPHA = 0.25
GAMMA = 2.0            # kernel assumes gamma == 2 (explicit squares, no pow)
WEIGHTS = (1.0, 1.0)

_NEG_FILL = -1e30      # T-edge fill: never wins the max, focal(-1e30, 0) == 0 exactly


def _round_up(x, m):
    return (x + m - 1) // m * m


def _focal_elementwise(x, t):
    """Focal BCE-with-logits; EUP-lean: one exp + one log shared by p and bce."""
    e = jnp.exp(-jnp.abs(x))                                  # EUP exp (once)
    bce = jnp.maximum(x, 0.0) - x * t + jnp.log1p(e)          # EUP log (once)
    inv = pl.reciprocal(1.0 + e, approx=False)                # exact 1/(1+e)
    p = jnp.where(x >= 0.0, inv, e * inv)                     # sigmoid(x) from shared e
    one_m_p = 1.0 - p
    # gamma == 2.0 -> explicit squares instead of pow
    return (t * (ALPHA * (one_m_p * one_m_p)) * bce
            + (1.0 - t) * (p * p) * bce)


def _bce_focal_2way_kernel(logit_ref, fw_ref, target_ref, out_ref, max_sc,
                           *, t_total, t_tile, weights):
    t_idx = pl.program_id(1)

    num_t = pl.cdiv(t_total, t_tile)          # static Python int
    rem = t_total - (num_t - 1) * t_tile      # static: valid rows in last T block
    ragged_t = rem != t_tile

    # Single init (collapsed _init/_update pair): running max starts at -1e30.
    @pl.when(t_idx == 0)
    def _init():
        max_sc[...] = jnp.full_like(max_sc, _NEG_FILL)

    def _accum(block):
        # Max in the streamed dtype (exact); upcast only the small (TB, C) result.
        local = jnp.max(block, axis=1)
        max_sc[...] = jnp.maximum(max_sc[...], local.astype(jnp.float32))

    if not ragged_t:
        _accum(fw_ref[...])
    else:
        # Common path: full blocks, no masking cost.
        @pl.when(t_idx != num_t - 1)
        def _body():
            _accum(fw_ref[...])

        # Last T step only: mask the out-of-range frames before the max
        # (garbage past T must not leak into valid (b, c) maxima).
        @pl.when(t_idx == num_t - 1)
        def _edge():
            fw = fw_ref[...]
            pos = jax.lax.broadcasted_iota(jnp.int32, (1,) + fw.shape[1:], 1)
            fill = jnp.asarray(_NEG_FILL, dtype=fw.dtype)
            _accum(jnp.where(pos < rem, fw, fill))

    # Finalize once per B tile: both focal terms, elementwise-weighted partials.
    @pl.when(t_idx == num_t - 1)
    def _finalize():
        x = logit_ref[...].astype(jnp.float32)
        t = target_ref[...].astype(jnp.float32)
        m = max_sc[...]
        out_ref[...] = (weights[0] * _focal_elementwise(x, t)
                        + weights[1] * _focal_elementwise(m, t))


def bce_focal_2way_loss(logit, framewise_logit, target, *, t_tile=None, b_tile=None):
    B, C = logit.shape
    Bf, T, Cf = framewise_logit.shape
    assert (Bf, Cf) == (B, C) and target.shape == (B, C)

    itemsize = jnp.dtype(framewise_logit.dtype).itemsize

    # B tile: sublane-aligned; grows with B, but keeps >=2 parallel tiles when
    # B > 8 so both v7x TensorCores get work (single-TC v5e/v6e unaffected).
    if b_tile is None:
        if B >= 64:
            b_tile = 32
        elif B >= 32:
            b_tile = 16
        else:
            b_tile = 8
    TB = _round_up(b_tile, 8)
    num_b = pl.cdiv(B, TB)
    B_pad = num_b * TB

    # T tile: target ~8 MiB framewise block per grid step (x2 pipeline buffers
    # => ~16 MiB), balanced across steps so no tile is mostly filler; multiple
    # of 8 sublanes.  Fits the scoped-VMEM budget of every generation (v7x has
    # only 64 MiB physical / 32 MiB scoped).
    if t_tile is None:
        target_bytes = 8 * 1024 * 1024
        cap = max(8, (target_bytes // (TB * C * itemsize)) // 8 * 8)
        n_steps = pl.cdiv(T, cap)
        t_tile = min(cap, _round_up(pl.cdiv(T, n_steps), 8))
    TT = max(8, _round_up(t_tile, 8))
    TT = min(TT, _round_up(T, 8))
    num_t = pl.cdiv(T, TT)

    # Only the tiny [B, C] tensors get (cheaply) padded in B; the big [B, T, C]
    # tensor is streamed unpadded -- ragged edges handled in-kernel / by the
    # wrapper slice below.
    logit_p = jnp.pad(logit, ((0, B_pad - B), (0, 0)))
    target_p = jnp.pad(target, ((0, B_pad - B), (0, 0)))

    fw_block_bytes = TB * TT * C * itemsize
    vmem_limit = int(min(64 * 1024 * 1024,
                         max(32 * 1024 * 1024, 2 * fw_block_bytes + 4 * 1024 * 1024)))

    grid = (num_b, num_t)

    partials = pl.pallas_call(
        partial(_bce_focal_2way_kernel, t_total=T, t_tile=TT, weights=WEIGHTS),
        out_shape=jax.ShapeDtypeStruct((B_pad, C), jnp.float32),
        grid_spec=pltpu.PrefetchScalarGridSpec(
            num_scalar_prefetch=0,
            grid=grid,
            in_specs=[
                pl.BlockSpec((TB, C), lambda b, t: (b, 0)),          # logit  (T-resident)
                pl.BlockSpec((TB, TT, C), lambda b, t: (b, t, 0)),   # framewise (pipelined)
                pl.BlockSpec((TB, C), lambda b, t: (b, 0)),          # target (T-resident)
            ],
            out_specs=pl.BlockSpec((TB, C), lambda b, t: (b, 0)),    # per-B-tile partials
            scratch_shapes=[pltpu.VMEM((TB, C), jnp.float32)],       # running T-max
        ),
        compiler_params=pltpu.CompilerParams(
            dimension_semantics=("parallel", "arbitrary"),
            vmem_limit_bytes=vmem_limit,
        ),
    )(logit_p, framewise_logit, target_p)

    # Exclude padded B rows (they may hold garbage-derived values); one divide
    # by the true element count gives the mean.
    return jnp.sum(partials[:B, :]) / (B * C)


def _reference(logit, framewise_logit, target):
    """Pure-JAX transcription of the PyTorch BCEFocal2WayLoss forward."""
    def focal_mean(x, t):
        bce = jnp.maximum(x, 0.0) - x * t + jnp.log1p(jnp.exp(-jnp.abs(x)))
        p = jax.nn.sigmoid(x)
        return jnp.mean(t * ALPHA * (1.0 - p) ** GAMMA * bce
                        + (1.0 - t) * p ** GAMMA * bce)

    x = logit.astype(jnp.float32)
    t = target.astype(jnp.float32)
    clip_max = jnp.max(framewise_logit.astype(jnp.float32), axis=1)
    return WEIGHTS[0] * focal_mean(x, t) + WEIGHTS[1] * focal_mean(clip_max, t)


if __name__ == "__main__":
    # Small, deliberately unaligned shapes: ragged B (6 % 8), ragged T (26),
    # non-lane-multiple C (40) -- exercises all edge handling paths.
    B, T, C = 6, 26, 40
    key = jax.random.PRNGKey(0)
    k1, k2, k3 = jax.random.split(key, 3)

    logit = jax.random.normal(k1, (B, C), dtype=jnp.float32)
    framewise_logit = jax.random.normal(k2, (B, T, C), dtype=jnp.float32)
    target = (jax.random.uniform(k3, (B, C)) > 0.5).astype(jnp.float32)

    ref = _reference(logit, framewise_logit, target)

    # Multi-T-tile path (running max + ragged last T block) ...
    r_tiled = jax.block_until_ready(
        bce_focal_2way_loss(logit, framewise_logit, target, t_tile=8))
    # ... the default auto-sized tiling ...
    r_auto = jax.block_until_ready(
        bce_focal_2way_loss(logit, framewise_logit, target))
    # ... and bf16 streaming of the big tensor (halved HBM bytes path).
    fw_bf16 = framewise_logit.astype(jnp.bfloat16)
    r_bf16 = jax.block_until_ready(
        bce_focal_2way_loss(logit, fw_bf16, target, t_tile=16))
    ref_bf16 = _reference(logit, fw_bf16, target)

    assert jnp.allclose(r_tiled, ref, atol=1e-5, rtol=1e-5), (r_tiled, ref)
    assert jnp.allclose(r_auto, ref, atol=1e-5, rtol=1e-5), (r_auto, ref)
    assert jnp.allclose(r_bf16, ref_bf16, atol=1e-4, rtol=1e-4), (r_bf16, ref_bf16)

    print("KERNEL_OK")
</pallas_src>

<mosaic_0001>
module attributes {stable_mosaic.version = 11 : i64} {
  func.func @_bce_focal_2way_kernel(%arg0: i32, %arg1: i32, %arg2: memref<8x40xf32, #tpu.memory_space<vmem>>, %arg3: memref<8x8x40xf32, #tpu.memory_space<vmem>>, %arg4: memref<8x40xf32, #tpu.memory_space<vmem>>, %arg5: memref<8x40xf32, #tpu.memory_space<vmem>>, %arg6: memref<8x40xf32, #tpu.memory_space<vmem>>) attributes {dimension_semantics = [#tpu.dimension_semantics<parallel>, #tpu.dimension_semantics<arbitrary>], iteration_bounds = array<i64: 1, 4>, scalar_prefetch = 0 : i64, scratch_operands = 1 : i64, tpu.core_type = #tpu.core_type<tc>, window_params = [{transform_indices = @transform_0, window_bounds = array<i64: 8, 40>}, {transform_indices = @transform_1, window_bounds = array<i64: 8, 8, 40>}, {transform_indices = @transform_2, window_bounds = array<i64: 8, 40>}, {transform_indices = @transform_3, window_bounds = array<i64: 8, 40>}]} {
    %c0_i32 = arith.constant 0 : i32
    %0 = arith.cmpi eq, %arg1, %c0_i32 : i32
    %1 = arith.extui %0 : i1 to i32
    %c0_i32_0 = arith.constant 0 : i32
    %2 = arith.cmpi ne, %1, %c0_i32_0 : i32
    scf.if %2 {
      %cst = arith.constant -1.000000e+30 : f32
      %12 = vector.broadcast %cst : f32 to vector<8x40xf32>
      %c0 = arith.constant 0 : index
      %c0_6 = arith.constant 0 : index
      %13 = vector.load %arg6[%c0, %c0_6] : memref<8x40xf32, #tpu.memory_space<vmem>>, vector<8x40xf32>
      tpu.vector_store %arg6[%c0, %c0_6], %12 {strides = array<i32>} : memref<8x40xf32, #tpu.memory_space<vmem>>, vector<8x40xf32>,
    } else {
    }
    %c3_i32 = arith.constant 3 : i32
    %3 = arith.cmpi ne, %arg1, %c3_i32 : i32
    %4 = arith.extui %3 : i1 to i32
    %c0_i32_1 = arith.constant 0 : i32
    %5 = arith.cmpi ne, %4, %c0_i32_1 : i32
    scf.if %5 {
      %c0 = arith.constant 0 : index
      %c0_6 = arith.constant 0 : index
      %c0_7 = arith.constant 0 : index
      %12 = vector.load %arg3[%c0, %c0_6, %c0_7] : memref<8x8x40xf32, #tpu.memory_space<vmem>>, vector<8x8x40xf32>
      %cst = arith.constant dense<0xFF800000> : vector<8x40xf32>
      %13 = vector.multi_reduction <maximumf>, %12, %cst [1] : vector<8x8x40xf32> to vector<8x40xf32>
      %c0_8 = arith.constant 0 : index
      %c0_9 = arith.constant 0 : index
      %14 = vector.load %arg6[%c0_8, %c0_9] : memref<8x40xf32, #tpu.memory_space<vmem>>, vector<8x40xf32>
      %15 = arith.maximumf %14, %13 : vector<8x40xf32>
      %c0_10 = arith.constant 0 : index
      %c0_11 = arith.constant 0 : index
      %16 = vector.load %arg6[%c0_10, %c0_11] : memref<8x40xf32, #tpu.memory_space<vmem>>, vector<8x40xf32>
      tpu.vector_store %arg6[%c0_10, %c0_11], %15 {strides = array<i32>} : memref<8x40xf32, #tpu.memory_space<vmem>>, vector<8x40xf32>,
    } else {
    }
    %c3_i32_2 = arith.constant 3 : i32
    %6 = arith.cmpi eq, %arg1, %c3_i32_2 : i32
    %7 = arith.extui %6 : i1 to i32
    %c0_i32_3 = arith.constant 0 : i32
    %8 = arith.cmpi ne, %7, %c0_i32_3 : i32
    scf.if %8 {
      %c0 = arith.constant 0 : index
      %c0_6 = arith.constant 0 : index
      %c0_7 = arith.constant 0 : index
      %12 = vector.load %arg3[%c0, %c0_6, %c0_7] : memref<8x8x40xf32, #tpu.memory_space<vmem>>, vector<8x8x40xf32>
      %13 = tpu.iota {dimensions = array<i32: 1>} : vector<1x8x40xi32>
      %c2_i32 = arith.constant 2 : i32
      %14 = vector.broadcast %c2_i32 : i32 to vector<1x8x40xi32>
      %15 = arith.cmpi slt, %13, %14 : vector<1x8x40xi32>
      %cst = arith.constant -1.000000e+30 : f32
      %16 = vector.shape_cast %15 : vector<1x8x40xi1> to vector<1x8x40xi1>
      %17 = vector.broadcast %16 : vector<1x8x40xi1> to vector<8x8x40xi1>
      %18 = vector.broadcast %cst : f32 to vector<8x8x40xf32>
      %19 = arith.select %17, %12, %18 : vector<8x8x40xi1>, vector<8x8x40xf32>
      %cst_8 = arith.constant dense<0xFF800000> : vector<8x40xf32>
      %20 = vector.multi_reduction <maximumf>, %19, %cst_8 [1] : vector<8x8x40xf32> to vector<8x40xf32>
      %c0_9 = arith.constant 0 : index
      %c0_10 = arith.constant 0 : index
      %21 = vector.load %arg6[%c0_9, %c0_10] : memref<8x40xf32, #tpu.memory_space<vmem>>, vector<8x40xf32>
      %22 = arith.maximumf %21, %20 : vector<8x40xf32>
      %c0_11 = arith.constant 0 : index
      %c0_12 = arith.constant 0 : index
      %23 = vector.load %arg6[%c0_11, %c0_12] : memref<8x40xf32, #tpu.memory_space<vmem>>, vector<8x40xf32>
      tpu.vector_store %arg6[%c0_11, %c0_12], %22 {strides = array<i32>} : memref<8x40xf32, #tpu.memory_space<vmem>>, vector<8x40xf32>,
    } else {
    }
    %c3_i32_4 = arith.constant 3 : i32
    %9 = arith.cmpi eq, %arg1, %c3_i32_4 : i32
    %10 = arith.extui %9 : i1 to i32
    %c0_i32_5 = arith.constant 0 : i32
    %11 = arith.cmpi ne, %10, %c0_i32_5 : i32
    scf.if %11 {
      %c0 = arith.constant 0 : index
      %c0_6 = arith.constant 0 : index
      %12 = vector.load %arg2[%c0, %c0_6] : memref<8x40xf32, #tpu.memory_space<vmem>>, vector<8x40xf32>
      %c0_7 = arith.constant 0 : index
      %c0_8 = arith.constant 0 : index
      %13 = vector.load %arg4[%c0_7, %c0_8] : memref<8x40xf32, #tpu.memory_space<vmem>>, vector<8x40xf32>
      %c0_9 = arith.constant 0 : index
      %c0_10 = arith.constant 0 : index
      %14 = vector.load %arg6[%c0_9, %c0_10] : memref<8x40xf32, #tpu.memory_space<vmem>>, vector<8x40xf32>
      %15 = math.absf %12 : vector<8x40xf32>
      %cst = arith.constant 0.000000e+00 : f32
      %16 = vector.broadcast %cst : f32 to vector<8x40xf32>
      %17 = arith.subf %16, %15 : vector<8x40xf32>
      %18 = math.exp %17 : vector<8x40xf32>
      %cst_11 = arith.constant 0.000000e+00 : f32
      %19 = vector.broadcast %cst_11 : f32 to vector<8x40xf32>
      %20 = arith.maximumf %12, %19 : vector<8x40xf32>
      %21 = arith.mulf %12, %13 : vector<8x40xf32>
      %22 = arith.subf %20, %21 : vector<8x40xf32>
      %23 = math.log1p %18 : vector<8x40xf32>
      %24 = arith.addf %22, %23 : vector<8x40xf32>
      %cst_12 = arith.constant 1.000000e+00 : f32
      %25 = vector.broadcast %cst_12 : f32 to vector<8x40xf32>
      %26 = arith.addf %25, %18 : vector<8x40xf32>
      %27 = tpu.reciprocal %26 : vector<8x40xf32> -> vector<8x40xf32>
      %cst_13 = arith.constant 0.000000e+00 : f32
      %28 = vector.broadcast %cst_13 : f32 to vector<8x40xf32>
      %29 = arith.cmpf oge, %12, %28 : vector<8x40xf32>
      %30 = arith.mulf %18, %27 : vector<8x40xf32>
      %31 = arith.select %29, %27, %30 : vector<8x40xi1>, vector<8x40xf32>
      %cst_14 = arith.constant 1.000000e+00 : f32
      %32 = vector.broadcast %cst_14 : f32 to vector<8x40xf32>
      %33 = arith.subf %32, %31 : vector<8x40xf32>
      %34 = arith.mulf %33, %33 : vector<8x40xf32>
      %cst_15 = arith.constant 2.500000e-01 : f32
      %35 = vector.broadcast %cst_15 : f32 to vector<8x40xf32>
      %36 = arith.mulf %35, %34 : vector<8x40xf32>
      %37 = arith.mulf %13, %36 : vector<8x40xf32>
      %38 = arith.mulf %37, %24 : vector<8x40xf32>
      %cst_16 = arith.constant 1.000000e+00 : f32
      %39 = vector.broadcast %cst_16 : f32 to vector<8x40xf32>
      %40 = arith.subf %39, %13 : vector<8x40xf32>
      %41 = arith.mulf %31, %31 : vector<8x40xf32>
      %42 = arith.mulf %40, %41 : vector<8x40xf32>
      %43 = arith.mulf %42, %24 : vector<8x40xf32>
      %44 = arith.addf %38, %43 : vector<8x40xf32>
      %cst_17 = arith.constant 1.000000e+00 : f32
      %45 = vector.broadcast %cst_17 : f32 to vector<8x40xf32>
      %46 = arith.mulf %45, %44 : vector<8x40xf32>
      %47 = math.absf %14 : vector<8x40xf32>
      %cst_18 = arith.constant 0.000000e+00 : f32
      %48 = vector.broadcast %cst_18 : f32 to vector<8x40xf32>
      %49 = arith.subf %48, %47 : vector<8x40xf32>
      %50 = math.exp %49 : vector<8x40xf32>
      %cst_19 = arith.constant 0.000000e+00 : f32
      %51 = vector.broadcast %cst_19 : f32 to vector<8x40xf32>
      %52 = arith.maximumf %14, %51 : vector<8x40xf32>
      %53 = arith.mulf %14, %13 : vector<8x40xf32>
      %54 = arith.subf %52, %53 : vector<8x40xf32>
      %55 = math.log1p %50 : vector<8x40xf32>
      %56 = arith.addf %54, %55 : vector<8x40xf32>
      %cst_20 = arith.constant 1.000000e+00 : f32
      %57 = vector.broadcast %cst_20 : f32 to vector<8x40xf32>
      %58 = arith.addf %57, %50 : vector<8x40xf32>
      %59 = tpu.reciprocal %58 : vector<8x40xf32> -> vector<8x40xf32>
      %cst_21 = arith.constant 0.000000e+00 : f32
      %60 = vector.broadcast %cst_21 : f32 to vector<8x40xf32>
      %61 = arith.cmpf oge, %14, %60 : vector<8x40xf32>
      %62 = arith.mulf %50, %59 : vector<8x40xf32>
      %63 = arith.select %61, %59, %62 : vector<8x40xi1>, vector<8x40xf32>
      %cst_22 = arith.constant 1.000000e+00 : f32
      %64 = vector.broadcast %cst_22 : f32 to vector<8x40xf32>
      %65 = arith.subf %64, %63 : vector<8x40xf32>
      %66 = arith.mulf %65, %65 : vector<8x40xf32>
      %cst_23 = arith.constant 2.500000e-01 : f32
      %67 = vector.broadcast %cst_23 : f32 to vector<8x40xf32>
      %68 = arith.mulf %67, %66 : vector<8x40xf32>
      %69 = arith.mulf %13, %68 : vector<8x40xf32>
      %70 = arith.mulf %69, %56 : vector<8x40xf32>
      %cst_24 = arith.constant 1.000000e+00 : f32
      %71 = vector.broadcast %cst_24 : f32 to vector<8x40xf32>
      %72 = arith.subf %71, %13 : vector<8x40xf32>
      %73 = arith.mulf %63, %63 : vector<8x40xf32>
      %74 = arith.mulf %72, %73 : vector<8x40xf32>
      %75 = arith.mulf %74, %56 : vector<8x40xf32>
      %76 = arith.addf %70, %75 : vector<8x40xf32>
      %cst_25 = arith.constant 1.000000e+00 : f32
      %77 = vector.broadcast %cst_25 : f32 to vector<8x40xf32>
      %78 = arith.mulf %77, %76 : vector<8x40xf32>
      %79 = arith.addf %46, %78 : vector<8x40xf32>
      %c0_26 = arith.constant 0 : index
      %c0_27 = arith.constant 0 : index
      %80 = vector.load %arg5[%c0_26, %c0_27] : memref<8x40xf32, #tpu.memory_space<vmem>>, vector<8x40xf32>
      tpu.vector_store %arg5[%c0_26, %c0_27], %79 {strides = array<i32>} : memref<8x40xf32, #tpu.memory_space<vmem>>, vector<8x40xf32>,
    } else {
    }
    return
  }
  func.func @transform_0(%arg0: i32, %arg1: i32) -> (i32, i32) {
    %c0_i32 = arith.constant 0 : i32
    %c0_i32_0 = arith.constant 0 : i32
    return %arg0, %c0_i32 : i32, i32
  }
  func.func @transform_1(%arg0: i32, %arg1: i32) -> (i32, i32, i32) {
    %c0_i32 = arith.constant 0 : i32
    %c0_i32_0 = arith.constant 0 : i32
    return %arg0, %arg1, %c0_i32 : i32, i32, i32
  }
  func.func @transform_2(%arg0: i32, %arg1: i32) -> (i32, i32) {
    %c0_i32 = arith.constant 0 : i32
    %c0_i32_0 = arith.constant 0 : i32
    return %arg0, %c0_i32 : i32, i32
  }
  func.func @transform_3(%arg0: i32, %arg1: i32) -> (i32, i32) {
    %c0_i32 = arith.constant 0 : i32
    %c0_i32_0 = arith.constant 0 : i32
    return %arg0, %c0_i32 : i32, i32
  }
}

</mosaic_0001>

<bundles_post_ra>
// kernel: tpu_custom_call.1
= control target key start
LH: loop header
LB: loop body
LE: loop exit
PB: predicated region body
PF: predicated region fallthrough
CT: control target
= control target key end

     0   :  { %8 = vsyncpa [#allocation4], 0  ;;  %s1115_s0 = inlined_call_operand.hbm [shape: f32[8,40], index: 0, kind: input, shape index: {}]   ;;  %s1116_s1 = inlined_call_operand.hbm [shape: f32[6,26,40], index: 1, kind: input, shape index: {}]   ;;  %s1117_s2 = inlined_call_operand.hbm [shape: f32[8,40], index: 2, kind: input, shape index: {}]   ;;  %s1118_s3 = inlined_call_operand.hbm [shape: f32[8,40], index: 3, kind: output, shape index: {}]  }
   0x1   :  { %9 = vsyncpa [#allocation7], 0 }
   0x2   :  { %11 = vsyncpa [#allocation7 + $0x1], 0 }
   0x3   :  { %12 = vsyncpa [#allocation5], 0  ;;  %s919_s12 = smov 0   ;;  %s921_s13 = smov 0  }
   0x4   :  { %s923_s14 = smov 0   ;;  %s925_s15 = smov 0  }
   0x5   :  { %s927_s16 = smov 0   ;;  %s929_s17 = smov 0  }
   0x6 LB: > { %s948_s18 = sadd.s32 4294967295, %s889_s17   ;;  %s27_s19 = sadd.s32 1, %s885_s16  ;;  %s889_s17 = sphi %s929_s17, %s18_s17   ;;  %s885_s16 = sphi %s927_s16, %s1137_s16   ;;  %s881_s15 = sphi %s925_s15, %s1136_s15   ;;  %s877_s14 = sphi %s923_s14, %s1135_s14   ;;  %s873_s13 = sphi %s921_s13, %s1134_s13   ;;  %s869_s12 = sphi %s919_s12, %s1133_s12  }
   0x7   : > { %p28_p0 = scmp.ge.s32.totalorder %s27_s19, 4  ;;  %s65_s20 = sadd.s32 1, %s877_s14 }
   0x8   : > { %p72_p1 = scmp.ne.s32.totalorder %s877_s14, %s873_s13  ;;  %p73_p2 = scmp.eq.s32.totalorder %s889_s17, 0 }
   0x9   : > { %s1139_s19 = smov (%p28_p0, %s27_s19), 0  ;;  %p78_p4 = scmp.ne.s32.totalorder %s873_s13, %s869_s12 }
   0xa   : > { %p957_p3 = por %p73_p2, %p72_p1  ;;  %s61_s22 = ssub.s32 %s885_s16, %s1139_s19 }
   0xb   : > { %p1119_p5 = scmp.eq.s32.totalorder %s948_s18, 0  ;;  %p63_p6 = scmp.eq.s32.totalorder %s61_s22, 0 }
   0xc   : > { %s1122_s21 = scalar_select %p957_p3, 1, 0 }
   0xd   : > { %p619_p7 = scmp.ge.s32.totalorder %s889_s17, 1  ;;  %p968_p8 = por %p1119_p5, %p78_p4 }
   0xe   : > { %p141_p9 = scmp.lt.s32.totalorder %s889_s17, 5  ;;  %s891_s26 = smov [#allocation3]  }
   0xf   : > { %s1123_s23 = scalar_select %p968_p8, 1, 0 }
  0x10   : > { %s974_s24 = scalar_select %p63_p6, %s877_s14, %s65_s20  }
  0x11   : > { %p976_p10 = pnand %p619_p7, %p141_p9  ;;  %s156_s27 = sshll.u32 %s891_s26, 4  ;;  %s157_s27 = int_to_ptr.vmem [resolvable:$true] %s156_s27 }
  0x12   : > { %s892_s28 = smov [#allocation8]   ;;  %s740_s4 = scalar_lea.vmem %s157_s27, 128 }
  0x13   : > { %s1124_s25 = scalar_select %p976_p10, 1, 0 }
  0x14   : > { %p649_p11 = pneg %p976_p10  ;;  %s169_s29 = sshll.u32 %s892_s28, 4  ;;  %s170_s29 = int_to_ptr.vmem [resolvable:$true] %s169_s29 }
  0x15   : > { %p741_p0 = scmp.ne.s32.totalorder %s157_s27, %s740_s4  ;;  %p748_p4 = scmp.lt.s32.totalorder %s157_s27, %s157_s27 }
  0x16   : > { %p984_p12 = pnand %p649_p11, %p1119_p5  ;;  %p749_p6 = scmp.lt.s32.totalorder %s740_s4, %s740_s4 }
  0x18   : > { %p731_p13 = pneg %p984_p12  ;;  %p750_p7 = por %p749_p6, %p748_p4 }
  0x1a   : > { %p743_p1 = pnand %p741_p0, %p731_p13 }
  0x1c   : > { %p744_p2 = pneg %p743_p1 }
  0x1e   : > { %p751_p9 = pnand %p750_p7, %p744_p2 }
  0x20   : > { %754 = shalt.err (!%p751_p9)
}
  0x21   : > { %652 = dma.hbm_to_vmem [thread:$0]  (!%p984_p12), %s1115_s0, 128, %s157_s27, [#allocation4]  }
  0x22   : > { %s766_s7 = scalar_lea.vmem %s170_s29, 128  ;;  %p774_p0 = scmp.lt.s32.totalorder %s170_s29, %s170_s29 }
  0x23   : > { %p767_p11 = scmp.ne.s32.totalorder %s170_s29, %s766_s7  ;;  %p775_p1 = scmp.lt.s32.totalorder %s766_s7, %s766_s7 }
  0x25   : > { %p769_p5 = pnand %p767_p11, %p731_p13  ;;  %p776_p10 = por %p775_p1, %p774_p0 }
  0x27   : > { %p770_p8 = pneg %p769_p5 }
  0x29   : > { %p777_p3 = pnand %p776_p10, %p770_p8 }
  0x2b   : > { %780 = shalt.err (!%p777_p3)
}
  0x2c   : > { %655 = dma.hbm_to_vmem [thread:$0]  (!%p984_p12), %s1117_s2, 128, %s170_s29, [#allocation7]  }
  0x2d   : > { %p622_p2 = scmp.ge.s32.totalorder %s889_s17, 4 }
  0x2e   : > { %p1126_p4 = scmp.ne.s32.totalorder (!%p622_p2), %s1122_s21, 0 }
  0x2f   : > { %176 = sbr.rel (%p622_p2) target bundleno = 72 (0x48), region = 24 }
  0x34   : > { %179 = sbr.rel (!%p1126_p4) target bundleno = 72 (0x48), region = 28  ;;  %s180_s10 = sand.u32 (%p1126_p4), 1, %s889_s17  }
  0x35   : > { %s182_s11 = sand.u32 (%p1126_p4), 1, %s877_s14   ;;  %s181_s20 = scalar_lea.sflag (%p1126_p4), [#allocation7], %s180_s10 }
  0x36   : > { %s623_s12 = sshll.u32 (%p1126_p4), %s182_s11, 6 }
  0x37   : > { %s184_s22 = scalar_lea.vmem (%p1126_p4), [#allocation6], %s623_s12 }
  0x39   : > { %190 = vsyncadd %s181_s20, 256  ;;  %s624_s26 = sshll.u32 %s885_s16, 7  ;;  %s197_s27 = sshll.u32 %s184_s22, 4  ;;  %s198_s27 = int_to_ptr.vmem [resolvable:$true] %s197_s27 }
  0x3a   : > { %s195_s29 = scalar_lea.hbm %s1116_s1, %s624_s26  ;;  %s791_s4 = scalar_lea.vmem %s198_s27, 768 }
  0x3b   : > { %p792_p3 = scmp.ne.s32.totalorder %s198_s27, %s791_s4  ;;  %s893_s21 = smov [#allocation6]  }
  0x3c   : > { %s793_s5 = sshll.u32 %s893_s21, 4  ;;  %s794_s5 = int_to_ptr.vmem [resolvable:$false] %s793_s5 }
  0x3d   : > { %s795_s6 = scalar_lea.vmem %s794_s5, 2048  ;;  %p796_p5 = scmp.lt.s32.totalorder %s198_s27, %s794_s5 }
  0x3e   : > { %p797_p8 = scmp.lt.s32.totalorder %s795_s6, %s791_s4 }
  0x40   : > { %p798_p10 = por %p797_p8, %p796_p5 }
  0x42   : > { %p799_p12 = pnand %p798_p10, %p792_p3 }
  0x44   : > { %802 = shalt.err (!%p799_p12)
}
  0x45   : > { %s894_s7 = smov 512   ;;  %s895_s8 = smov 128  }
  0x46   : > { %s896_s9 = smov 8  }
  0x47   : > { %203 = dma.hbm_to_vmem [thread:$0]  %s195_s29, 768, %s198_s27, %s181_s20, %s894_s7, %s895_s8, %s896_s9  }
  0x48 PF: > { %p1127_p13 = scmp.ne.s32.totalorder %s1124_s25, 0 }
  0x49   : > { %p1128_p6 = scmp.eq.s32.totalorder (!%p1127_p13), %s948_s18, 0 }
  0x4a   : > { %209 = sbr.rel (%p1127_p13) target bundleno = 242 (0xf2), region = 32 }
  0x4f   : > { %852 = dma.done.wait (%p1128_p6), [#allocation4], 128   ;;  %p1129_p7 = pmov %p1128_p6 }
  0x50   : > { %s215_s10 = sand.u32 1, %s948_s18   ;;  %s217_s11 = sand.u32 1, %s873_s13  }
  0x51   : > { %854 = vsyncadd (%p1129_p7), [#allocation4], 4294967168  ;;  %s627_s12 = sshll.u32 %s217_s11, 6  ;;  %s216_s22 = scalar_lea.sflag [#allocation7], %s215_s10 }
  0x52   : > { %s1023_s26 = scalar_lea.vmem [#allocation6], %s627_s12  ;;  %p1130_p9 = scmp.ne.s32.totalorder %s1123_s23, 0 }
  0x54   : > { %856 = dma.done.wait (%p1130_p9), %s216_s22, 1024  }
  0x55   : > { %858 = vsyncadd (%p1130_p9), %s216_s22, 4294966272  ;;  %p1131_p11 = pmov %p1128_p6 }
  0x56   : > { %p1132_p0 = pmov %p1128_p6 }
  0x57   : > { %860 = dma.done.wait (%p1131_p11), [#allocation7], 128  }
  0x58   : > { %862 = vsyncadd (%p1132_p0), [#allocation7], 4294967168  ;;  %p629_p1 = scmp.ne.s32.totalorder %s881_s15, 0 }
  0x5a   : > { %247 = sbr.rel (%p629_p1) target bundleno = 97 (0x61), region = 48 }
  0x5f   : > { %vm248_vm0 = vcmask 326656   ;;  %v897_v0 = vmov -1e+30  }
  0x60   : > { %249 = vst.msk [vmem:[#allocation2] sm:$0xff] %vm248_vm0, %v897_v0 }
  0x61 PF: > { %p630_p2 = scmp.eq.s32.totalorder %s881_s15, 3 }
  0x63   : > { %253 = sbr.rel (%p630_p2) target bundleno = 128 (0x80), region = 52 }
  0x68   : > { %v254_v1 = vld [vmem:[%s1023_s26] sm:$0xff]  ;;  %v255_v2 = vld [vmem:[%s1023_s26 + $0x8] sm:$0xff]  ;;  %v256_v3 = vld [vmem:[%s1023_s26 + $0x10] sm:$0xff]  ;;  %vm262_vm1 = vcmask 326656   ;;  %vm328_vm2 = vcmask 1041409   ;;  %vm330_vm3 = vcmask 1042434  }
  0x69   : > { %v257_v4 = vld [vmem:[%s1023_s26 + $0x18] sm:$0xff]  ;;  %v258_v5 = vld [vmem:[%s1023_s26 + $0x20] sm:$0xff]  ;;  %v259_v6 = vld [vmem:[%s1023_s26 + $0x28] sm:$0xff]  ;;  %v263_v7 = vsel %vm262_vm1, %v254_v1, -inf  ;;  %v270_v8 = vsel %vm262_vm1, %v255_v2, -inf  ;;  %v277_v9 = vsel %vm262_vm1, %v256_v3, -inf }
  0x6a   : > { %v260_v10 = vld [vmem:[%s1023_s26 + $0x30] sm:$0xff]  ;;  %v261_v11 = vld [vmem:[%s1023_s26 + $0x38] sm:$0xff]  ;;  %v264_v12 = vrot.slane %v263_v7, 4  ;;  %v271_v13 = vrot.slane %v270_v8, 4  ;;  %v278_v14 = vrot.slane %v277_v9, 4  ;;  %v284_v15 = vsel %vm262_vm1, %v257_v4, -inf }
  0x6b   : > { %v285_v16 = vrot.slane %v284_v15, 4  ;;  %v291_v17 = vsel %vm262_vm1, %v258_v5, -inf  ;;  %v298_v18 = vsel %vm262_vm1, %v259_v6, -inf  ;;  %v305_v19 = vsel %vm262_vm1, %v260_v10, -inf  ;;  %v319_v5 = vld [vmem:[#allocation2] sm:$0xff] }
  0x6c   : > { %v265_v20 = vmax.f32 %v263_v7, %v264_v12  ;;  %v272_v21 = vmax.f32 %v270_v8, %v271_v13  ;;  %v279_v22 = vmax.f32 %v277_v9, %v278_v14  ;;  %v292_v23 = vrot.slane %v291_v17, 4 }
  0x6d   : > { %v286_v24 = vmax.f32 %v284_v15, %v285_v16  ;;  %v299_v25 = vrot.slane %v298_v18, 4  ;;  %v306_v26 = vrot.slane %v305_v19, 4  ;;  %v312_v27 = vsel %vm262_vm1, %v261_v11, -inf }
  0x6e   : > { %v266_v28 = vrot.slane %v265_v20, 2  ;;  %v273_v29 = vrot.slane %v272_v21, 2  ;;  %v280_v30 = vrot.slane %v279_v22, 2  ;;  %v293_v31 = vmax.f32 %v291_v17, %v292_v23 }
  0x6f   : > { %v287_v32 = vrot.slane %v286_v24, 2  ;;  %v300_v33 = vmax.f32 %v298_v18, %v299_v25  ;;  %v307_v34 = vmax.f32 %v305_v19, %v306_v26  ;;  %v313_v35 = vrot.slane %v312_v27, 4 }
  0x70   : > { %v267_v36 = vmax.f32 %v265_v20, %v266_v28  ;;  %v274_v37 = vmax.f32 %v272_v21, %v273_v29  ;;  %v281_v38 = vmax.f32 %v279_v22, %v280_v30  ;;  %v294_v39 = vrot.slane %v293_v31, 2 }
  0x71   : > { %v288_v40 = vmax.f32 %v286_v24, %v287_v32  ;;  %v301_v41 = vrot.slane %v300_v33, 2  ;;  %v308_v42 = vrot.slane %v307_v34, 2  ;;  %v314_v43 = vmax.f32 %v312_v27, %v313_v35 }
  0x72   : > { %v268_v44 = vrot.slane %v267_v36, 1  ;;  %v275_v45 = vrot.slane %v274_v37, 1  ;;  %v282_v46 = vrot.slane %v281_v38, 1  ;;  %v295_v47 = vmax.f32 %v293_v31, %v294_v39 }
  0x73   : > { %v289_v48 = vrot.slane %v288_v40, 1  ;;  %v302_v49 = vmax.f32 %v300_v33, %v301_v41  ;;  %v309_v50 = vmax.f32 %v307_v34, %v308_v42  ;;  %v315_v51 = vrot.slane %v314_v43, 2 }
  0x74   : > { %v269_v52 = vmax.f32 %v267_v36, %v268_v44  ;;  %v276_v53 = vmax.f32 %v274_v37, %v275_v45  ;;  %v283_v54 = vmax.f32 %v281_v38, %v282_v46  ;;  %v296_v55 = vrot.slane %v295_v47, 1 }
  0x75   : > { %v290_v56 = vmax.f32 %v288_v40, %v289_v48  ;;  %v303_v57 = vrot.slane %v302_v49, 1  ;;  %v310_v58 = vrot.slane %v309_v50, 1  ;;  %v316_v59 = vmax.f32 %v314_v43, %v315_v51 }
  0x76   : > { %v297_v60 = vmax.f32 %v295_v47, %v296_v55  ;;  %v329_v61 = vsel %vm328_vm2, %v276_v53, %v269_v52  ;;  %vm332_vm4 = vcmask 1043459   ;;  %vm334_vm5 = vcmask 1044484  }
  0x77   : > { %v304_v62 = vmax.f32 %v302_v49, %v303_v57  ;;  %v311_v63 = vmax.f32 %v309_v50, %v310_v58  ;;  %v317_v0 = vrot.slane %v316_v59, 1  ;;  %v331_v1 = vsel %vm330_vm3, %v283_v54, %v329_v61 }
  0x78   : > { %v333_v2 = vsel %vm332_vm4, %v290_v56, %v331_v1  ;;  %vm336_vm6 = vcmask 1045509   ;;  %vm338_vm7 = vcmask 1046534   ;;  %vm340_vm8 = vcmask 1047559  }
  0x79   : > { %v318_v3 = vmax.f32 %v316_v59, %v317_v0  ;;  %v335_v4 = vsel %vm334_vm5, %v297_v60, %v333_v2 }
  0x7a   : > { %v337_v6 = vsel %vm336_vm6, %v304_v62, %v335_v4 }
  0x7b   : > { %v339_v7 = vsel %vm338_vm7, %v311_v63, %v337_v6 }
  0x7c   : > { %v341_v8 = vsel %vm340_vm8, %v318_v3, %v339_v7 }
  0x7d   : > { %v343_v9 = vmax.f32 %v319_v5, %v341_v8 }
  0x7f   : > { %344 = vst.msk [vmem:[#allocation2] sm:$0xff] %vm262_vm1, %v343_v9 }
  0x80 PF: > { %p631_p4 = scmp.ne.s32.totalorder %s881_s15, 3 }
  0x82   : > { %348 = sbr.rel (%p631_p4) target bundleno = 227 (0xe3), region = 56 }
  0x87   : > { %v357_v10 = vlaneseq  ;;  %v349_v11 = vld [vmem:[%s1023_s26] sm:$0xff]  ;;  %v350_v12 = vld [vmem:[%s1023_s26 + $0x8] sm:$0xff]  ;;  %v351_v13 = vld [vmem:[%s1023_s26 + $0x10] sm:$0xff]  ;;  %vm370_vm10 = vcmask 326656   ;;  %vm436_vm11 = vcmask 1041409   ;;  %vm438_vm12 = vcmask 1042434  }
  0x88   : > { %v352_v14 = vld [vmem:[%s1023_s26 + $0x18] sm:$0xff]  ;;  %v353_v16 = vld [vmem:[%s1023_s26 + $0x20] sm:$0xff]  ;;  %v354_v17 = vld [vmem:[%s1023_s26 + $0x28] sm:$0xff]  ;;  %vm440_vm13 = vcmask 1043459   ;;  %vm442_vm14 = vcmask 1044484   ;;  %vm444_vm15 = vcmask 1045509  }
  0x89   : > { %v358_v15 = vshrl.u32 %v357_v10, 7  ;;  %v1061_v18 = vld [vmem:[#allocation3] sm:$0xff]  ;;  %v355_v19 = vld [vmem:[%s1023_s26 + $0x30] sm:$0xff]  ;;  %vm446_vm0 = vcmask 1046534   ;;  %vm448_vm1 = vcmask 1047559  }
  0x8a   : > { %v356_v20 = vld [vmem:[%s1023_s26 + $0x38] sm:$0xff]  ;;  %v456_v21 = vand.u32 2147483647, %v1061_v18  ;;  %vm475_vm2 = vcmp.ge.f32.partialorder %v1061_v18, 0.0 }
  0x8b   : > { %vm359_vm9 = vcmp.lt.s32.totalorder %v358_v15, 2 }
  0x8c   : > { %v362_v22 = vsel %vm359_vm9, %v349_v11, -1e+30  ;;  %v363_v23 = vsel %vm359_vm9, %v350_v12, -1e+30  ;;  %v364_v24 = vsel %vm359_vm9, %v351_v13, -1e+30 }
  0x8d   : > { %v365_v25 = vsel %vm359_vm9, %v352_v14, -1e+30  ;;  %v366_v26 = vsel %vm359_vm9, %v353_v16, -1e+30  ;;  %v367_v27 = vsel %vm359_vm9, %v354_v17, -1e+30 }
  0x8e   : > { %v368_v28 = vsel %vm359_vm9, %v355_v19, -1e+30  ;;  %v369_v29 = vsel %vm359_vm9, %v356_v20, -1e+30  ;;  %v371_v30 = vsel %vm370_vm10, %v362_v22, -inf  ;;  %v378_v31 = vsel %vm370_vm10, %v363_v23, -inf }
  0x8f   : > { %v372_v32 = vrot.slane %v371_v30, 4  ;;  %v379_v33 = vrot.slane %v378_v31, 4  ;;  %v385_v34 = vsel %vm370_vm10, %v364_v24, -inf  ;;  %v392_v35 = vsel %vm370_vm10, %v365_v25, -inf }
  0x90   : > { %v386_v36 = vrot.slane %v385_v34, 4  ;;  %v393_v37 = vrot.slane %v392_v35, 4  ;;  %v399_v38 = vsel %vm370_vm10, %v366_v26, -inf  ;;  %v406_v39 = vsel %vm370_vm10, %v367_v27, -inf }
  0x91   : > { %v373_v40 = vmax.f32 %v371_v30, %v372_v32  ;;  %v380_v41 = vmax.f32 %v378_v31, %v379_v33  ;;  %v400_v42 = vrot.slane %v399_v38, 4  ;;  %v407_v43 = vrot.slane %v406_v39, 4  ;;  %v427_v30 = vld [vmem:[#allocation2] sm:$0xff] }
  0x92   : > { %v387_v44 = vmax.f32 %v385_v34, %v386_v36  ;;  %v394_v45 = vmax.f32 %v392_v35, %v393_v37  ;;  %v413_v46 = vsel %vm370_vm10, %v368_v28, -inf  ;;  %v420_v47 = vsel %vm370_vm10, %v369_v29, -inf }
  0x93   : > { %v374_v48 = vrot.slane %v373_v40, 2  ;;  %v381_v49 = vrot.slane %v380_v41, 2  ;;  %v401_v50 = vmax.f32 %v399_v38, %v400_v42  ;;  %v408_v51 = vmax.f32 %v406_v39, %v407_v43 }
  0x94   : > { %v388_v52 = vrot.slane %v387_v44, 2  ;;  %v395_v53 = vrot.slane %v394_v45, 2  ;;  %v414_v54 = vrot.slane %v413_v46, 4  ;;  %v421_v55 = vrot.slane %v420_v47, 4 }
  0x95   : > { %v375_v56 = vmax.f32 %v373_v40, %v374_v48  ;;  %v382_v57 = vmax.f32 %v380_v41, %v381_v49  ;;  %v402_v58 = vrot.slane %v401_v50, 2  ;;  %v409_v59 = vrot.slane %v408_v51, 2 }
  0x96   : > { %v389_v60 = vmax.f32 %v387_v44, %v388_v52  ;;  %v396_v61 = vmax.f32 %v394_v45, %v395_v53  ;;  %v415_v62 = vmax.f32 %v413_v46, %v414_v54  ;;  %v422_v63 = vmax.f32 %v420_v47, %v421_v55 }
  0x97   : > { %v376_v0 = vrot.slane %v375_v56, 1  ;;  %v383_v1 = vrot.slane %v382_v57, 1  ;;  %v403_v2 = vmax.f32 %v401_v50, %v402_v58  ;;  %v410_v3 = vmax.f32 %v408_v51, %v409_v59  ;;  %v454_v50 = vld [vmem:[#allocation8] sm:$0xff] }
  0x98   : > { %v390_v4 = vrot.slane %v389_v60, 1  ;;  %v397_v5 = vrot.slane %v396_v61, 1  ;;  %v416_v6 = vrot.slane %v415_v62, 2  ;;  %v423_v7 = vrot.slane %v422_v63, 2 }
  0x99   : > { %v377_v8 = vmax.f32 %v375_v56, %v376_v0  ;;  %v384_v9 = vmax.f32 %v382_v57, %v383_v1  ;;  %v404_v10 = vrot.slane %v403_v2, 1  ;;  %v411_v11 = vrot.slane %v410_v3, 1 }
  0x9a   : > { %v391_v12 = vmax.f32 %v389_v60, %v390_v4  ;;  %v398_v13 = vmax.f32 %v396_v61, %v397_v5  ;;  %v417_v14 = vmax.f32 %v415_v62, %v416_v6  ;;  %v424_v15 = vmax.f32 %v422_v63, %v423_v7 }
  0x9b   : > { %v405_v16 = vmax.f32 %v403_v2, %v404_v10  ;;  %v412_v17 = vmax.f32 %v410_v3, %v411_v11  ;;  %v437_v19 = vsel %vm436_vm11, %v384_v9, %v377_v8  ;;  %v457_v20 = vsub.f32 0.0, %v456_v21 }
  0x9c   : > { %v418_v22 = vrot.slane %v417_v14, 1  ;;  %v425_v23 = vrot.slane %v424_v15, 1  ;;  %v439_v24 = vsel %vm438_vm12, %v391_v12, %v437_v19  ;;  %v460_v51 = vmax.f32 %v1061_v18, 0.0 }
  0x9d   : > { %v441_v25 = vsel %vm440_vm13, %v398_v13, %v439_v24  ;;  %v458_v26 = vmul.f32 1.442695, %v457_v20  ;;  %v461_v52 = vmul.f32 %v454_v50, %v1061_v18  ;;  %v483_v1 = vsub.f32 1.0, %v454_v50 }
  0x9e   : > { %v419_v27 = vmax.f32 %v417_v14, %v418_v22  ;;  %v426_v28 = vmax.f32 %v424_v15, %v425_v23  ;;  %v443_v29 = vsel %vm442_vm14, %v405_v16, %v441_v25 }
  0x9f   : > { %v445_v31 = vsel %vm444_vm15, %v412_v17, %v443_v29  ;;  %717 = vpow2.f32 %v458_v26  ;;  %v462_v58 = vsub.f32 %v460_v51, %v461_v52 }
  0xa0   : > { %v447_v32 = vsel %vm446_vm0, %v419_v27, %v445_v31 }
  0xa1   : > { %v449_v33 = vsel %vm448_vm1, %v426_v28, %v447_v32 }
  0xa2   : > { %v451_v21 = vmax.f32 %v427_v30, %v449_v33 }
  0xa4   : > { %452 = vst.msk [vmem:[#allocation2] sm:$0xff] %vm370_vm10, %v451_v21 }
  0xab   : > { %v455_v34 = vld [vmem:[#allocation2] sm:$0xff] }
  0xac   : > { %v718_v35 = vpop.eup %717  ;;  %v488_v36 = vand.u32 2147483647, %v455_v34  ;;  %v492_v2 = vmax.f32 %v455_v34, 0.0  ;;  %vm507_vm4 = vcmp.ge.f32.partialorder %v455_v34, 0.0  ;;  %v493_v5 = vmul.f32 %v455_v34, %v454_v50 }
  0xad   : > { %v463_v37 = vadd.f32 1.0, %v718_v35  ;;  %v466_v44 = vmul.f32 -0.5, %v718_v35  ;;  %v469_v49 = vand.u32 2147483647, %v718_v35 }
  0xae   : > { %v489_v38 = vsub.f32 0.0, %v488_v36  ;;  %v494_v13 = vsub.f32 %v492_v2, %v493_v5 }
  0xaf   : > { %719 = vrcp.f32 %v463_v37  ;;  %v467_v46 = vadd.f32 1.0, %v466_v44  ;;  %vm470_vm3 = vcmp.lt.f32.partialorder %v469_v49, 0.0004427343 }
  0xb0   : > { %v490_v39 = vmul.f32 1.442695, %v489_v38 }
  0xb1   : > { %v468_v54 = vmul.f32 %v718_v35, %v467_v46 }
  0xb2   : > { %721 = vpow2.f32 %v490_v39 }
  0xb3   : > { %723 = vlog2.f32 %v463_v37 }
  0xbc   : > { %v720_v40 = vpop.eup %719 }
  0xbd   : > { %v476_v43 = vmul.f32 %v720_v40, %v718_v35 }
  0xbf   : > { %v722_v41 = vpop.eup %721  ;;  %v477_v45 = vsel %vm475_vm2, %v720_v40, %v476_v43 }
  0xc0   : > { %v495_v42 = vadd.f32 1.0, %v722_v41  ;;  %v478_v47 = vsub.f32 1.0, %v477_v45  ;;  %v724_v48 = vpop.eup %723  ;;  %v498_v56 = vmul.f32 -0.5, %v722_v41  ;;  %v484_v62 = vmul.f32 %v477_v45, %v477_v45 }
  0xc1   : > { %v465_v53 = vmul.f32 0.6931472, %v724_v48  ;;  %v501_v3 = vand.u32 2147483647, %v722_v41 }
  0xc2   : > { %725 = vlog2.f32 %v495_v42  ;;  %v479_v55 = vmul.f32 %v478_v47, %v478_v47  ;;  %v499_v63 = vadd.f32 1.0, %v498_v56  ;;  %v485_v8 = vmul.f32 %v484_v62, %v483_v1 }
  0xc3   : > { %727 = vrcp.f32 %v495_v42  ;;  %v471_v60 = vsel %vm470_vm3, %v468_v54, %v465_v53  ;;  %vm502_vm5 = vcmp.lt.f32.partialorder %v501_v3, 0.0004427343 }
  0xc4   : > { %v480_v61 = vmul.f32 0.25, %v479_v55  ;;  %v472_v4 = vadd.f32 %v471_v60, %v462_v58  ;;  %v500_v11 = vmul.f32 %v722_v41, %v499_v63 }
  0xc6   : > { %v481_v7 = vmul.f32 %v480_v61, %v454_v50  ;;  %v486_v16 = vmul.f32 %v485_v8, %v472_v4 }
  0xc8   : > { %v482_v15 = vmul.f32 %v481_v7, %v472_v4 }
  0xca   : > { %v487_v23 = vadd.f32 %v486_v16, %v482_v15 }
  0xcf   : > { %v726_v57 = vpop.eup %725 }
  0xd0   : > { %v728_v59 = vpop.eup %727  ;;  %v497_v18 = vmul.f32 0.6931472, %v726_v57 }
  0xd1   : > { %v508_v0 = vmul.f32 %v728_v59, %v722_v41 }
  0xd2   : > { %v503_v14 = vsel %vm502_vm5, %v500_v11, %v497_v18 }
  0xd3   : > { %v509_v6 = vsel %vm507_vm4, %v728_v59, %v508_v0  ;;  %v504_v20 = vadd.f32 %v503_v14, %v494_v13 }
  0xd4   : > { %v510_v9 = vsub.f32 1.0, %v509_v6  ;;  %v515_v10 = vmul.f32 %v509_v6, %v509_v6 }
  0xd6   : > { %v511_v12 = vmul.f32 %v510_v9, %v510_v9  ;;  %v516_v19 = vmul.f32 %v515_v10, %v483_v1 }
  0xd8   : > { %v512_v17 = vmul.f32 0.25, %v511_v12  ;;  %v517_v25 = vmul.f32 %v516_v19, %v504_v20 }
  0xda   : > { %v513_v22 = vmul.f32 %v512_v17, %v454_v50 }
  0xdc   : > { %v514_v24 = vmul.f32 %v513_v22, %v504_v20 }
  0xde   : > { %v518_v26 = vadd.f32 %v517_v25, %v514_v24 }
  0xe0   : > { %v519_v27 = vadd.f32 %v518_v26, %v487_v23 }
  0xe2   : > { %520 = vst.msk [vmem:[#allocation9] sm:$0xff] %vm370_vm10, %v519_v27 }
  0xe3 PF: > { %p660_p3 = scmp.eq.s32.totalorder %s948_s18, 3  ;;  %s898_s15 = smov [#allocation9]  }
  0xe4   : > { %s530_s23 = sshll.u32 %s898_s15, 4  ;;  %s531_s23 = int_to_ptr.vmem [resolvable:$true] %s530_s23 }
  0xe5   : > { %s803_s25 = scalar_lea.vmem %s531_s23, 128  ;;  %p810_p12 = scmp.lt.s32.totalorder %s531_s23, %s531_s23 }
  0xe6   : > { %p804_p5 = scmp.ne.s32.totalorder %s531_s23, %s803_s25  ;;  %p811_p13 = scmp.lt.s32.totalorder %s803_s25, %s803_s25 }
  0xe8   : > { %p805_p8 = pnand %p804_p5, %p660_p3  ;;  %p812_p6 = por %p811_p13, %p810_p12 }
  0xea   : > { %p806_p10 = pneg %p805_p8 }
  0xec   : > { %p813_p7 = pnand %p812_p6, %p806_p10 }
  0xee   : > { %816 = shalt.err (!%p813_p7)
}
  0xef   : > { %646 = dma.vmem_to_hbm [thread:$0]  (%p660_p3), %s531_s23, 128, %s1118_s3, [#allocation5]  }
  0xf0   : > { %864 = dma.done.wait (%p660_p3), [#allocation5], 128  }
  0xf1   : > { %866 = vsyncadd (%p660_p3), [#allocation5], 4294967168 }
  0xf2 PF: > { %s18_s17 = sadd.s32 1, %s889_s17   ;;  %s1133_s12 = smov %s873_s13 }
  0xf3   : > { %p15_p9 = scmp.ge.s32.totalorder %s18_s17, 6   ;;  %s1134_s13 = smov %s877_s14 }
  0xf4   : > { %s1135_s14 = smov %s974_s24  ;;  %s1136_s15 = smov %s885_s16 }
  0xf5   : > { %s1137_s16 = smov %s1139_s19  ;;  %17 = sbr.rel (!%p15_p9) target bundleno = 6 (0x6), region = 93 }
  0xfa   :  { %543 = vsyncpa [#allocation4], 1 }
  0xfb   :  { %545 = vsyncpa [#allocation4 + $0x1], 1 }
  0xfc   :  { %546 = vsyncpa [#allocation7], 1 }
  0xfd   :  { %548 = vsyncpa [#allocation7 + $0x1], 1 }
  0xfe   :  { %549 = vsyncpa [#allocation5], 1 }
  0xff   :  { %551 = vsyncpa [#allocation5 + $0x1], 1 }

</bundles_post_ra>
